<compile_context>
chip_gen: v5e
topology: v5e:2x2
jax: 0.10.0
libtpu: 0.0.40
codegen_flags: <defaults>
</compile_context>

<pallas_src>
import functools

import jax
import jax.numpy as jnp
from jax import lax
from jax.experimental import pallas as pl
from jax.experimental.pallas import tpu as pltpu


def _round_up(a, b):
    return (a + b - 1) // b * b


def _glu_kernel(x_ref, wt_ref, b_ref, out_ref, cnt_ref, *, tm, m_valid, m_padded):
    i = pl.program_id(0)

    x = x_ref[...]                                   # (tm, d), native dtype (MXU input)
    # nn.Linear: y = x @ W^T + b.  wt_ref already holds W^T; f32 accumulation.
    y = jnp.dot(x, wt_ref[...], preferred_element_type=jnp.float32) + b_ref[...]
    # ReLU6(y) / 6 in f32.
    x1 = jnp.clip(y, 0.0, 6.0) * (1.0 / 6.0)
    # Gated output.
    out_ref[...] = (x1 * x.astype(jnp.float32)).astype(out_ref.dtype)

    # score numerator: count of strictly-positive gate values (sign(x1) is 0/1,
    # and x1 > 0 iff y > 0 — reuse the pre-clip value, no sign() select needed).
    pos = y > 0.0
    if m_padded != m_valid:                          # static: mask zero-padded rows
        row = i * tm + lax.broadcasted_iota(jnp.int32, (tm, 1), 0)
        pos = jnp.logical_and(pos, row < m_valid)
    # Lane-wise per-tile partial counts (sublane reduce only); reduced outside.
    cnt_ref[...] = jnp.sum(pos.astype(jnp.float32), axis=0)[None, None, :]


def glu_pallas(x, weight, bias, *, tm=256, vmem_budget_bytes=28 * 1024 * 1024):
    """x: [bs, seq_len, d_model]; weight: [d_model, d_model] (nn.Linear [out, in]);
    bias: [d_model].  Returns (out [bs, seq_len, d_model], score f32 scalar)."""
    bs, seq_len, d_model = x.shape
    m = bs * seq_len

    x_itemsize = jnp.dtype(x.dtype).itemsize
    w_itemsize = jnp.dtype(weight.dtype).itemsize
    sub = 16 if x_itemsize == 2 else 8               # sublane alignment of row tiles

    # --- pick the row tile from the VMEM budget ------------------------------
    tm = _round_up(max(sub, min(tm, _round_up(m, sub))), sub)
    fixed = 2 * d_model * d_model * w_itemsize + 2 * d_model * 4   # W^T + bias (2-buffered)

    def _vmem_estimate(t):
        tile = 2 * t * d_model * x_itemsize          # x tile, double-buffered
        tile += 2 * t * d_model * x_itemsize         # out tile, double-buffered
        tile += 2 * d_model * 4                      # per-tile count partial
        return fixed + tile

    while tm > sub and _vmem_estimate(tm) > vmem_budget_bytes:
        tm = _round_up(tm // 2, sub)

    m_pad = _round_up(m, tm)
    n_tiles = m_pad // tm

    x2d = x.reshape(m, d_model)
    if m_pad != m:
        x2d = jnp.pad(x2d, ((0, m_pad - m), (0, 0)))
    wt = weight.T                                    # (d_in, d_out), native dtype
    b2d = bias.reshape(1, d_model).astype(jnp.float32)

    kernel = functools.partial(_glu_kernel, tm=tm, m_valid=m, m_padded=m_pad)

    cost = pl.CostEstimate(
        flops=2 * m_pad * d_model * d_model + 5 * m_pad * d_model,
        transcendentals=0,
        bytes_accessed=(2 * m_pad * d_model * x_itemsize       # x in + out
                        + d_model * d_model * w_itemsize       # W^T
                        + d_model * 4                          # bias
                        + n_tiles * d_model * 4),              # count partials
    )

    need = _vmem_estimate(tm)
    compiler_kwargs = dict(dimension_semantics=("parallel",))
    if need > 30 * 1024 * 1024:   # only raise the scoped-VMEM limit when required
        compiler_kwargs["vmem_limit_bytes"] = int(need * 1.25)

    out2d, cnt = pl.pallas_call(
        kernel,
        out_shape=(
            jax.ShapeDtypeStruct((m_pad, d_model), x.dtype),
            jax.ShapeDtypeStruct((n_tiles, 1, d_model), jnp.float32),
        ),
        grid_spec=pltpu.PrefetchScalarGridSpec(
            num_scalar_prefetch=0,
            grid=(n_tiles,),
            in_specs=[
                pl.BlockSpec((tm, d_model), lambda i: (i, 0)),
                pl.BlockSpec((d_model, d_model), lambda i: (0, 0)),
                pl.BlockSpec((1, d_model), lambda i: (0, 0)),
            ],
            out_specs=(
                pl.BlockSpec((tm, d_model), lambda i: (i, 0)),
                pl.BlockSpec((1, 1, d_model), lambda i: (i, 0, 0)),
            ),
        ),
        compiler_params=pltpu.CompilerParams(**compiler_kwargs),
        cost_estimate=cost,
    )(x2d, wt, b2d)

    out = out2d[:m].reshape(bs, seq_len, d_model)
    # Exact integer reduction of the per-tile positive-gate counts, then mean.
    count = jnp.sum(cnt.astype(jnp.int32))
    score = count.astype(jnp.float32) / jnp.float32(m * d_model)
    return out, score


if __name__ == "__main__":
    bs, seq_len, d_model = 2, 8, 32

    key = jax.random.PRNGKey(0)
    kx, kw, kb = jax.random.split(key, 3)

    # Deterministic nn.Linear-style init: U(-1/sqrt(d), 1/sqrt(d)).
    bound = 1.0 / jnp.sqrt(jnp.float32(d_model))
    weight = jax.random.uniform(kw, (d_model, d_model), jnp.float32, -bound, bound)
    bias = jax.random.uniform(kb, (d_model,), jnp.float32, -bound, bound)

    x = jax.random.normal(kx, (bs, seq_len, d_model), jnp.float32)

    out, score = glu_pallas(x, weight, bias)
    out = jax.block_until_ready(out)
    score = jax.block_until_ready(score)

    # Pure-JAX reference check.
    y_ref = x @ weight.T + bias
    x1_ref = jnp.clip(y_ref, 0.0, 6.0) / 6.0
    out_ref = x1_ref * x
    score_ref = jnp.mean(jnp.sign(x1_ref))

    assert jnp.allclose(out, out_ref, atol=1e-5, rtol=1e-5)
    assert jnp.allclose(score, score_ref, atol=1e-6)

    print("KERNEL_OK")
</pallas_src>

<mosaic_0001>
module attributes {stable_mosaic.version = 11 : i64} {
  func.func @_glu_kernel(%arg0: i32, %arg1: memref<16x32xf32, #tpu.memory_space<vmem>>, %arg2: memref<32x32xf32, #tpu.memory_space<vmem>>, %arg3: memref<1x32xf32, #tpu.memory_space<vmem>>, %arg4: memref<16x32xf32, #tpu.memory_space<vmem>>, %arg5: memref<1x1x32xf32, #tpu.memory_space<vmem>>) attributes {dimension_semantics = [#tpu.dimension_semantics<parallel>], iteration_bounds = array<i64: 1>, scalar_prefetch = 0 : i64, scratch_operands = 0 : i64, tpu.core_type = #tpu.core_type<tc>, window_params = [{transform_indices = @transform_0, window_bounds = array<i64: 16, 32>}, {pipeline_mode = #tpu.pipeline_mode<synchronous>, transform_indices = @transform_1, window_bounds = array<i64: 32, 32>}, {pipeline_mode = #tpu.pipeline_mode<synchronous>, transform_indices = @transform_2, window_bounds = array<i64: 1, 32>}, {transform_indices = @transform_3, window_bounds = array<i64: 16, 32>}, {transform_indices = @transform_4, window_bounds = array<i64: 1, 1, 32>}]} {
    %c0 = arith.constant 0 : index
    %c0_0 = arith.constant 0 : index
    %0 = vector.load %arg1[%c0, %c0_0] : memref<16x32xf32, #tpu.memory_space<vmem>>, vector<16x32xf32>
    %c0_1 = arith.constant 0 : index
    %c0_2 = arith.constant 0 : index
    %1 = vector.load %arg2[%c0_1, %c0_2] : memref<32x32xf32, #tpu.memory_space<vmem>>, vector<32x32xf32>
    %cst = arith.constant dense<0.000000e+00> : vector<16x32xf32>
    %2 = tpu.matmul %0, %1, %cst {dimension_numbers = #tpu.dot_dimension_numbers<[1], [0], [0], [1], [0, 0, 1, 1], [], []>} : vector<16x32xf32>, vector<32x32xf32>, vector<16x32xf32> -> vector<16x32xf32>
    %c0_3 = arith.constant 0 : index
    %c0_4 = arith.constant 0 : index
    %3 = vector.load %arg3[%c0_3, %c0_4] : memref<1x32xf32, #tpu.memory_space<vmem>>, vector<1x32xf32>
    %4 = vector.broadcast %3 : vector<1x32xf32> to vector<16x32xf32>
    %5 = arith.addf %2, %4 : vector<16x32xf32>
    %cst_5 = arith.constant 0.000000e+00 : f32
    %cst_6 = arith.constant 6.000000e+00 : f32
    %6 = vector.broadcast %cst_5 : f32 to vector<16x32xf32>
    %7 = arith.maximumf %6, %5 : vector<16x32xf32>
    %8 = vector.broadcast %cst_6 : f32 to vector<16x32xf32>
    %9 = arith.minimumf %8, %7 : vector<16x32xf32>
    %cst_7 = arith.constant 0.166666672 : f32
    %10 = vector.broadcast %cst_7 : f32 to vector<16x32xf32>
    %11 = arith.mulf %9, %10 : vector<16x32xf32>
    %12 = arith.mulf %11, %0 : vector<16x32xf32>
    %c0_8 = arith.constant 0 : index
    %c0_9 = arith.constant 0 : index
    %13 = vector.load %arg4[%c0_8, %c0_9] : memref<16x32xf32, #tpu.memory_space<vmem>>, vector<16x32xf32>
    tpu.vector_store %arg4[%c0_8, %c0_9], %12 {strides = array<i32>} : memref<16x32xf32, #tpu.memory_space<vmem>>, vector<16x32xf32>,
    %cst_10 = arith.constant 0.000000e+00 : f32
    %14 = vector.broadcast %cst_10 : f32 to vector<16x32xf32>
    %15 = arith.cmpf ogt, %5, %14 : vector<16x32xf32>
    %16 = arith.extui %15 : vector<16x32xi1> to vector<16x32xi32>
    %17 = arith.sitofp %16 : vector<16x32xi32> to vector<16x32xf32>
    %cst_11 = arith.constant dense<0.000000e+00> : vector<32xf32>
    %18 = vector.multi_reduction <add>, %17, %cst_11 [0] : vector<16x32xf32> to vector<32xf32>
    %19 = vector.shape_cast %18 : vector<32xf32> to vector<1x1x32xf32>
    %c0_12 = arith.constant 0 : index
    %c0_13 = arith.constant 0 : index
    %c0_14 = arith.constant 0 : index
    %20 = vector.load %arg5[%c0_12, %c0_13, %c0_14] : memref<1x1x32xf32, #tpu.memory_space<vmem>>, vector<1x1x32xf32>
    tpu.vector_store %arg5[%c0_12, %c0_13, %c0_14], %19 {strides = array<i32>} : memref<1x1x32xf32, #tpu.memory_space<vmem>>, vector<1x1x32xf32>,
    return
  }
  func.func @transform_0(%arg0: i32) -> (i32, i32) {
    %c0_i32 = arith.constant 0 : i32
    %c0_i32_0 = arith.constant 0 : i32
    return %arg0, %c0_i32 : i32, i32
  }
  func.func @transform_1(%arg0: i32) -> (i32, i32) {
    %c0_i32 = arith.constant 0 : i32
    %c0_i32_0 = arith.constant 0 : i32
    %c0_i32_1 = arith.constant 0 : i32
    return %c0_i32, %c0_i32_0 : i32, i32
  }
  func.func @transform_2(%arg0: i32) -> (i32, i32) {
    %c0_i32 = arith.constant 0 : i32
    %c0_i32_0 = arith.constant 0 : i32
    %c0_i32_1 = arith.constant 0 : i32
    return %c0_i32, %c0_i32_0 : i32, i32
  }
  func.func @transform_3(%arg0: i32) -> (i32, i32) {
    %c0_i32 = arith.constant 0 : i32
    %c0_i32_0 = arith.constant 0 : i32
    return %arg0, %c0_i32 : i32, i32
  }
  func.func @transform_4(%arg0: i32) -> (i32, i32, i32) {
    %c0_i32 = arith.constant 0 : i32
    %c0_i32_0 = arith.constant 0 : i32
    %c0_i32_1 = arith.constant 0 : i32
    return %arg0, %c0_i32, %c0_i32_0 : i32, i32, i32
  }
}

</mosaic_0001>

<bundles_post_ra>
// kernel: tpu_custom_call.1
= control target key start
LH: loop header
LB: loop body
LE: loop exit
PB: predicated region body
PF: predicated region fallthrough
CT: control target
= control target key end

     0   :  { %10 = vsyncpa [#allocation3], 0  ;;  %s335_s0 = inlined_call_operand.hbm [shape: f32[16,32], index: 0, kind: input, shape index: {}]   ;;  %s336_s1 = inlined_call_operand.hbm [shape: f32[32,32], index: 1, kind: input, shape index: {}]   ;;  %s337_s2 = inlined_call_operand.vmem [shape: f32[1,32], index: 2, kind: input, shape index: {}]   ;;  %s338_s3 = inlined_call_operand.hbm [shape: f32[16,32], index: 3, kind: output, shape index: {0}]   ;;  %s339_s4 = inlined_call_operand.hbm [shape: f32[1,1,32], index: 4, kind: output, shape index: {1}]  }
   0x1   :  { %11 = vsyncpa [#allocation6], 0 }
   0x2   :  { %12 = vsyncpa [#allocation4], 0 }
   0x3   :  { %13 = vsyncpa [#allocation9], 0  ;;  %s18_s17 = sshll.u32 %s335_s0, 4  ;;  %s273_s18 = smov [#allocation2]   ;;  %s19_s17 = int_to_ptr.hbm [resolvable:$true] %s18_s17 }
   0x4   :  { %s20_s19 = sshll.u32 %s273_s18, 4  ;;  %s31_s22 = sshll.u32 %s336_s1, 4  ;;  %s21_s19 = int_to_ptr.vmem [resolvable:$true] %s20_s19  ;;  %s32_s22 = int_to_ptr.hbm [resolvable:$true] %s31_s22 }
   0x5   :  { %s274_s23 = smov 128   ;;  %s275_s24 = smov 8  }
   0x6   :  { %26 = dma.hbm_to_vmem [thread:$0]  %s19_s17, 256, %s21_s19, [#allocation3], %s274_s23, %s274_s23, %s275_s24  }
   0x7   :  { %s276_s25 = smov [#allocation5]  }
   0x8   :  { %s33_s26 = sshll.u32 %s276_s25, 4  ;;  %s34_s26 = int_to_ptr.vmem [resolvable:$true] %s33_s26 }
   0x9   :  { %39 = dma.hbm_to_vmem [thread:$0]  %s32_s22, 512, %s34_s26, [#allocation6], %s274_s23, %s274_s23, %s275_s24  }
   0xa   :  { %265 = dma.done.wait [#allocation3], 256  }
   0xb   :  { %266 = vsyncadd [#allocation3], 4294967040 }
   0xc   :  { %267 = dma.done.wait [#allocation6], 512  }
   0xd   :  { %268 = vsyncadd [#allocation6], 4294966784  ;;  %v55_v0 = vld [vmem:[#allocation5 + $0x18] sm:$0xff]  ;;  %v54_v1 = vld [vmem:[#allocation5 + $0x10] sm:$0xff]  ;;  %vm60_vm0 = vcmask 261120   ;;  %v277_v13 = vmov 0.0  }
   0xe   :  { %79 = vmatpush.msra.mxu0 %v55_v0  ;;  %157 = vmatpush.msra.mxu1 %v55_v0  ;;  %v53_v2 = vld [vmem:[#allocation5 + $0x8] sm:$0xff]  ;;  %v52_v3 = vld [vmem:[#allocation5] sm:$0xff]  ;;  %v50_v4 = vld [vmem:[#allocation2] sm:$0xff]  ;;  %s123_s30 = sshll.u32 %s338_s3, 4  ;;  %s279_s5 = smov [#allocation8]   ;;  %vm115_vm3 = vcmask 253952   ;;  %s124_s30 = int_to_ptr.hbm [resolvable:$true] %s123_s30 }
   0xf   :  { %v51_v5 = vld [vmem:[#allocation2 + $0x8] sm:$0xff]  ;;  %v168_v6 = vld [vmem:[%s337_s2] ss:$0 sm:$0xff]  ;;  %s278_s2 = smov [#allocation7]   ;;  %s135_s6 = sshll.u32 %s279_s5, 4  ;;  %s136_s6 = int_to_ptr.vmem [resolvable:$true] %s135_s6 }
  0x10   :  { %80 = vmatpush.msra.mxu0 %v54_v1  ;;  %158 = vmatpush.msra.mxu1 %v54_v1  ;;  %s121_s27 = sshll.u32 %s278_s2, 4  ;;  %s137_s8 = sshll.u32 %s339_s4, 4  ;;  %s122_s27 = int_to_ptr.vmem [resolvable:$true] %s121_s27  ;;  %s138_s8 = int_to_ptr.hbm [resolvable:$true] %s137_s8 }
  0x12   :  { %81 = vmatpush.msra.mxu0 %v53_v2  ;;  %159 = vmatpush.msra.mxu1 %v53_v2 }
  0x14   :  { %82 = vmatpush.msra.mxu0 %v52_v3  ;;  %160 = vmatpush.msra.mxu1 %v52_v3 }
  0x15   :  { %153 = vmatmul.msk.f32.vlgmr.msra.gmra.mxu0 %vm60_vm0, %v50_v4  ;;  %154 = vmatmul.msk.f32.vlgmr.msra.gmra.mxu1 %vm60_vm0, %v51_v5 }
  0x92   :  { %v84_v7 = vpop.f32.mrf.mxu0  ;;  %v87_v8 = vpop.f32.mrf.mxu1 }
  0x93   :  { %v85_v9 = vadd.f32 %v168_v6, %v84_v7  ;;  %v88_v10 = vadd.f32 %v168_v6, %v87_v8 }
  0x95   :  { %v90_v11 = vmax.f32 %v85_v9, 0.0  ;;  %vm100_vm1 = vcmp.gt.f32.partialorder %v85_v9, 0.0  ;;  %v91_v12 = vmax.f32 %v88_v10, 0.0  ;;  %vm101_vm2 = vcmp.gt.f32.partialorder %v88_v10, 0.0 }
  0x96   :  { %v155_v14 = vsel %vm100_vm1, 1.0, %v277_v13  ;;  %v156_v15 = vsel %vm101_vm2, 1.0, %v277_v13 }
  0x97   :  { %v92_v16 = vmin.f32 %v90_v11, 6.0  ;;  %v106_v17 = vsel %vm60_vm0, %v155_v14, 0.0  ;;  %v93_v18 = vmin.f32 %v91_v12, 6.0  ;;  %v107_v19 = vsel %vm60_vm0, %v156_v15, 0.0 }
  0x98   :  { %v108_v20 = vadd.f32 %v107_v19, %v106_v17 }
  0x99   :  { %v94_v21 = vmul.f32 0.16666667, %v92_v16  ;;  %v95_v22 = vmul.f32 0.16666667, %v93_v18 }
  0x9a   :  { %v109_v23 = vrot.slane %v108_v20, 4 }
  0x9b   :  { %v96_v24 = vmul.f32 %v94_v21, %v50_v4  ;;  %v97_v25 = vmul.f32 %v95_v22, %v51_v5 }
  0x9c   :  { %v110_v26 = vadd.f32 %v109_v23, %v108_v20 }
  0x9d   :  { %98 = vst.msk [vmem:[#allocation7] sm:$0xff] %vm60_vm0, %v96_v24 }
  0x9e   :  { %v111_v27 = vrot.slane %v110_v26, 2  ;;  %99 = vst.msk [vmem:[#allocation7 + $0x8] sm:$0xff] %vm60_vm0, %v97_v25 }
  0x9f   :  { %129 = dma.vmem_to_hbm [thread:$0]  %s122_s27, 256, %s124_s30, [#allocation4], %s274_s23, %s274_s23, %s275_s24  }
  0xa0   :  { %v112_v28 = vadd.f32 %v111_v27, %v110_v26 }
  0xa2   :  { %v113_v29 = vrot.slane %v112_v28, 1 }
  0xa4   :  { %v114_v30 = vadd.f32 %v113_v29, %v112_v28 }
  0xa6   :  { %116 = vst.msk [vmem:[#allocation8] sm:$0x1] %vm115_vm3, %v114_v30 }
  0xa7   :  { %140 = dma.vmem_to_hbm [thread:$0]  %s136_s6, 16, %s138_s8, [#allocation9]  }
  0xa8   :  { %269 = dma.done.wait [#allocation4], 256  }
  0xa9   :  { %270 = vsyncadd [#allocation4], 4294967040 }
  0xaa   :  { %271 = dma.done.wait [#allocation9], 16  }
  0xab   :  { %272 = vsyncadd [#allocation9], 4294967280 }
  0xac   :  { %149 = vsyncpa [#allocation3], 1 }
  0xad   :  { %150 = vsyncpa [#allocation6], 1 }
  0xae   :  { %151 = vsyncpa [#allocation4], 1 }
  0xaf   :  { %152 = vsyncpa [#allocation9], 1 }

</bundles_post_ra>
